<compile_context>
chip_gen: v7x
topology: tpu7x:2x2x1
jax: 0.10.0
libtpu: 0.0.40
codegen_flags: <defaults>
</compile_context>

<pallas_src>
import jax
import jax.numpy as jnp
from jax.experimental import pallas as pl
from jax.experimental.pallas import tpu as pltpu

LN_EPS = 1e-5      # torch.nn.LayerNorm default
TM_MAX = 1024      # max batch-tile rows (multiple of 8)
LANE = 128         # TPU lane width


def _round_up(x, m):
    return ((x + m - 1) // m) * m


def _cdiv(a, b):
    return -(-a // b)


def _layernorm(x, gamma, beta):
    # One-pass stats: mean = E[x], var = E[x^2] - mean^2 (biased, PyTorch
    # semantics).  Both reduces are independent -> shorter VPU/XLU chain.
    mean = jnp.mean(x, axis=-1, keepdims=True)
    mean_sq = jnp.mean(x * x, axis=-1, keepdims=True)
    var = mean_sq - mean * mean
    inv = jax.lax.rsqrt(var + LN_EPS)
    return (x - mean) * inv * gamma + beta


def actor_kernel(x_ref,
                 w1_ref, p1_ref,
                 w2_ref, p2_ref,
                 w3_ref, p3_ref,
                 out_ref):
    # p1/p2 pack (bias, gamma, beta) as rows 0/1/2; p3 packs (bias, action_bound),
    # both zero-padded to LANE columns in the head.
    x = x_ref[...]                                   # f32, K is tiny -> keep f32

    # fc1 -> LayerNorm -> ReLU (f32 matmul; negligible MXU work, better parity)
    h = jnp.dot(x, w1_ref[...], preferred_element_type=jnp.float32) + p1_ref[0:1, :]
    h = _layernorm(h, p1_ref[1:2, :], p1_ref[2:3, :])
    h = jnp.maximum(h, 0.0).astype(jnp.bfloat16)

    # fc2 -> LayerNorm -> ReLU (bf16 MXU matmul, f32 accumulate + elementwise)
    h = jnp.dot(h, w2_ref[...], preferred_element_type=jnp.float32) + p2_ref[0:1, :]
    h = _layernorm(h, p2_ref[1:2, :], p2_ref[2:3, :])
    h = jnp.maximum(h, 0.0).astype(jnp.bfloat16)

    # mu -> tanh -> scale by action_bound (padded lanes: w=b=ab=0 -> store 0)
    mu = jnp.dot(h, w3_ref[...], preferred_element_type=jnp.float32) + p3_ref[0:1, :]
    out_ref[...] = (p3_ref[1:2, :] * jnp.tanh(mu)).astype(out_ref.dtype)


@jax.jit
def actor_forward(state, params):
    (w1, b1, g1, be1, w2, b2, g2, be2, w3, b3, ab) = params
    batch, input_dim = state.shape
    n_actions = w3.shape[1]
    n_out = _round_up(n_actions, LANE)               # lane-dense output width

    # Pack the tiny per-feature vectors into one small tensor per layer.
    p1 = jnp.concatenate([b1, g1, be1], axis=0).astype(jnp.float32)   # (3, fc1)
    p2 = jnp.concatenate([b2, g2, be2], axis=0).astype(jnp.float32)   # (3, fc2)
    p3 = jnp.concatenate([b3, ab], axis=0).astype(jnp.float32)        # (2, n_actions)
    p3 = jnp.pad(p3, ((0, 0), (0, n_out - n_actions)))                # zero lanes

    # fc1 weight stays f32 (K tiny); fc2/mu weights feed the MXU in bf16.
    w1f = w1.astype(jnp.float32)
    w2b = w2.astype(jnp.bfloat16)
    w3b = jnp.pad(w3, ((0, 0), (0, n_out - n_actions))).astype(jnp.bfloat16)

    # Batch tiling: >=2 tiles whenever there is enough work (both v7x TCs busy),
    # at most 7 dead rows padded per tile.
    bp0 = max(8, _round_up(batch, 8))
    n_tiles = _cdiv(bp0, TM_MAX)
    if bp0 >= 16:
        n_tiles = max(n_tiles, 2)
    tm = _round_up(_cdiv(bp0, n_tiles), 8)
    bp = n_tiles * tm
    x = state if bp == batch else jnp.pad(state, ((0, bp - batch), (0, 0)))

    const = lambda a: pl.BlockSpec(a.shape, lambda i: (0, 0))  # VMEM-resident

    out = pl.pallas_call(
        actor_kernel,
        out_shape=jax.ShapeDtypeStruct((bp, n_out), jnp.float32),
        grid=(n_tiles,),
        in_specs=[pl.BlockSpec((tm, input_dim), lambda i: (i, 0)),
                  const(w1f), const(p1),
                  const(w2b), const(p2),
                  const(w3b), const(p3)],
        out_specs=pl.BlockSpec((tm, n_out), lambda i: (i, 0)),
        compiler_params=pltpu.CompilerParams(
            dimension_semantics=("parallel",)),      # megacore-shard batch on v7x
    )(x, w1f, p1, w2b, p2, w3b, p3)

    return out[:batch, :n_actions]


def init_actor_params(key, input_dim, fc1_dims, fc2_dims, n_actions, action_bound):
    """Deterministic init matching the PyTorch module's scheme.

    PyTorch fc weights are (out, in); f = 1/sqrt(weight.size(0)) = 1/sqrt(out).
    We store weights transposed as (in, out) for the kernel.
    """
    k1w, k1b, k2w, k2b, k3w, k3b = jax.random.split(key, 6)

    f1 = 1.0 / jnp.sqrt(jnp.float32(fc1_dims))
    f2 = 1.0 / jnp.sqrt(jnp.float32(fc2_dims))
    f3 = 0.003

    w1 = jax.random.uniform(k1w, (input_dim, fc1_dims), jnp.float32, -f1, f1)
    b1 = jax.random.uniform(k1b, (1, fc1_dims), jnp.float32, -f1, f1)
    g1 = jnp.ones((1, fc1_dims), jnp.float32)     # LayerNorm weight (default ones)
    be1 = jnp.zeros((1, fc1_dims), jnp.float32)   # LayerNorm bias   (default zeros)

    w2 = jax.random.uniform(k2w, (fc1_dims, fc2_dims), jnp.float32, -f2, f2)
    b2 = jax.random.uniform(k2b, (1, fc2_dims), jnp.float32, -f2, f2)
    g2 = jnp.ones((1, fc2_dims), jnp.float32)
    be2 = jnp.zeros((1, fc2_dims), jnp.float32)

    w3 = jax.random.uniform(k3w, (fc2_dims, n_actions), jnp.float32, -f3, f3)
    b3 = jax.random.uniform(k3b, (1, n_actions), jnp.float32, -f3, f3)

    ab = jnp.asarray(action_bound, jnp.float32).reshape(1, -1)
    if ab.shape[1] == 1 and n_actions > 1:
        ab = jnp.broadcast_to(ab, (1, n_actions))

    return (w1, b1, g1, be1, w2, b2, g2, be2, w3, b3, ab)


def _reference_forward(state, params):
    (w1, b1, g1, be1, w2, b2, g2, be2, w3, b3, ab) = params
    h = state @ w1 + b1
    m = h.mean(-1, keepdims=True)
    v = ((h - m) ** 2).mean(-1, keepdims=True)
    h = (h - m) / jnp.sqrt(v + LN_EPS) * g1 + be1
    h = jnp.maximum(h, 0.0)
    h = h @ w2 + b2
    m = h.mean(-1, keepdims=True)
    v = ((h - m) ** 2).mean(-1, keepdims=True)
    h = (h - m) / jnp.sqrt(v + LN_EPS) * g2 + be2
    h = jnp.maximum(h, 0.0)
    return ab * jnp.tanh(h @ w3 + b3)


if __name__ == "__main__":
    key = jax.random.PRNGKey(0)
    k_param, k_state = jax.random.split(key)

    # Small DDPG-style shapes; hidden dims chosen lane-dense (multiple of 128).
    batch, input_dim, fc1_dims, fc2_dims, n_actions = 32, 8, 128, 128, 4
    action_bound = jnp.array([2.0, 2.0, 1.0, 1.0], jnp.float32)

    params = init_actor_params(k_param, input_dim, fc1_dims, fc2_dims,
                               n_actions, action_bound)
    state = jax.random.normal(k_state, (batch, input_dim), jnp.float32)

    out = actor_forward(state, params)
    jax.block_until_ready(out)

    ref = _reference_forward(state, params)
    assert out.shape == (batch, n_actions)
    # fc2/mu take bf16 activations/weights on the MXU -> slightly loosened
    # tolerance vs the pure-f32 reference (fc1 is kept in f32 for parity).
    assert jnp.allclose(out, ref, atol=2e-2, rtol=2e-2)

    print("KERNEL_OK")
</pallas_src>

<mosaic_0001>
module attributes {stable_mosaic.version = 11 : i64} {
  func.func @actor_kernel(%arg0: i32, %arg1: memref<16x8xf32, #tpu.memory_space<vmem>>, %arg2: memref<8x128xf32, #tpu.memory_space<vmem>>, %arg3: memref<3x128xf32, #tpu.memory_space<vmem>>, %arg4: memref<128x128xbf16, #tpu.memory_space<vmem>>, %arg5: memref<3x128xf32, #tpu.memory_space<vmem>>, %arg6: memref<128x128xbf16, #tpu.memory_space<vmem>>, %arg7: memref<2x128xf32, #tpu.memory_space<vmem>>, %arg8: memref<16x128xf32, #tpu.memory_space<vmem>>) attributes {dimension_semantics = [#tpu.dimension_semantics<parallel>], iteration_bounds = array<i64: 2>, scalar_prefetch = 0 : i64, scratch_operands = 0 : i64, tpu.core_type = #tpu.core_type<tc>, window_params = [{transform_indices = @transform_0, window_bounds = array<i64: 16, 8>}, {pipeline_mode = #tpu.pipeline_mode<synchronous>, transform_indices = @transform_1, window_bounds = array<i64: 8, 128>}, {pipeline_mode = #tpu.pipeline_mode<synchronous>, transform_indices = @transform_2, window_bounds = array<i64: 3, 128>}, {pipeline_mode = #tpu.pipeline_mode<synchronous>, transform_indices = @transform_3, window_bounds = array<i64: 128, 128>}, {pipeline_mode = #tpu.pipeline_mode<synchronous>, transform_indices = @transform_4, window_bounds = array<i64: 3, 128>}, {pipeline_mode = #tpu.pipeline_mode<synchronous>, transform_indices = @transform_5, window_bounds = array<i64: 128, 128>}, {pipeline_mode = #tpu.pipeline_mode<synchronous>, transform_indices = @transform_6, window_bounds = array<i64: 2, 128>}, {transform_indices = @transform_7, window_bounds = array<i64: 16, 128>}]} {
    %c0 = arith.constant 0 : index
    %c0_0 = arith.constant 0 : index
    %0 = vector.load %arg1[%c0, %c0_0] : memref<16x8xf32, #tpu.memory_space<vmem>>, vector<16x8xf32>
    %c0_1 = arith.constant 0 : index
    %c0_2 = arith.constant 0 : index
    %1 = vector.load %arg2[%c0_1, %c0_2] : memref<8x128xf32, #tpu.memory_space<vmem>>, vector<8x128xf32>
    %cst = arith.constant dense<0.000000e+00> : vector<16x128xf32>
    %2 = tpu.matmul %0, %1, %cst {dimension_numbers = #tpu.dot_dimension_numbers<[1], [0], [0], [1], [0, 0, 1, 1], [], []>} : vector<16x8xf32>, vector<8x128xf32>, vector<16x128xf32> -> vector<16x128xf32>
    %c0_3 = arith.constant 0 : index
    %c0_4 = arith.constant 0 : index
    %3 = vector.load %arg3[%c0_3, %c0_4] : memref<3x128xf32, #tpu.memory_space<vmem>>, vector<1x128xf32>
    %4 = vector.broadcast %3 : vector<1x128xf32> to vector<16x128xf32>
    %5 = arith.addf %2, %4 : vector<16x128xf32>
    %c1 = arith.constant 1 : index
    %c0_5 = arith.constant 0 : index
    %6 = vector.load %arg3[%c1, %c0_5] : memref<3x128xf32, #tpu.memory_space<vmem>>, vector<1x128xf32>
    %c2 = arith.constant 2 : index
    %c0_6 = arith.constant 0 : index
    %7 = vector.load %arg3[%c2, %c0_6] : memref<3x128xf32, #tpu.memory_space<vmem>>, vector<1x128xf32>
    %cst_7 = arith.constant dense<0.000000e+00> : vector<16xf32>
    %8 = vector.multi_reduction <add>, %5, %cst_7 [1] : vector<16x128xf32> to vector<16xf32>
    %9 = vector.shape_cast %8 : vector<16xf32> to vector<16x1xf32>
    %cst_8 = arith.constant 1.280000e+02 : f32
    %10 = vector.broadcast %cst_8 : f32 to vector<16x1xf32>
    %11 = arith.divf %9, %10 : vector<16x1xf32>
    %12 = arith.mulf %5, %5 : vector<16x128xf32>
    %cst_9 = arith.constant dense<0.000000e+00> : vector<16xf32>
    %13 = vector.multi_reduction <add>, %12, %cst_9 [1] : vector<16x128xf32> to vector<16xf32>
    %14 = vector.shape_cast %13 : vector<16xf32> to vector<16x1xf32>
    %cst_10 = arith.constant 1.280000e+02 : f32
    %15 = vector.broadcast %cst_10 : f32 to vector<16x1xf32>
    %16 = arith.divf %14, %15 : vector<16x1xf32>
    %17 = arith.mulf %11, %11 : vector<16x1xf32>
    %18 = arith.subf %16, %17 : vector<16x1xf32>
    %cst_11 = arith.constant 9.99999974E-6 : f32
    %19 = vector.broadcast %cst_11 : f32 to vector<16x1xf32>
    %20 = arith.addf %18, %19 : vector<16x1xf32>
    %21 = math.rsqrt %20 : vector<16x1xf32>
    %22 = vector.broadcast %11 : vector<16x1xf32> to vector<16x128xf32>
    %23 = arith.subf %5, %22 : vector<16x128xf32>
    %24 = vector.broadcast %21 : vector<16x1xf32> to vector<16x128xf32>
    %25 = arith.mulf %23, %24 : vector<16x128xf32>
    %26 = vector.broadcast %6 : vector<1x128xf32> to vector<16x128xf32>
    %27 = arith.mulf %25, %26 : vector<16x128xf32>
    %28 = vector.broadcast %7 : vector<1x128xf32> to vector<16x128xf32>
    %29 = arith.addf %27, %28 : vector<16x128xf32>
    %cst_12 = arith.constant 0.000000e+00 : f32
    %30 = vector.broadcast %cst_12 : f32 to vector<16x128xf32>
    %31 = arith.maximumf %29, %30 : vector<16x128xf32>
    %32 = arith.truncf %31 : vector<16x128xf32> to vector<16x128xbf16>
    %c0_13 = arith.constant 0 : index
    %c0_14 = arith.constant 0 : index
    %33 = vector.load %arg4[%c0_13, %c0_14] : memref<128x128xbf16, #tpu.memory_space<vmem>>, vector<128x128xbf16>
    %cst_15 = arith.constant dense<0.000000e+00> : vector<16x128xf32>
    %34 = tpu.matmul %32, %33, %cst_15 {dimension_numbers = #tpu.dot_dimension_numbers<[1], [0], [0], [1], [0, 0, 1, 1], [], []>} : vector<16x128xbf16>, vector<128x128xbf16>, vector<16x128xf32> -> vector<16x128xf32>
    %c0_16 = arith.constant 0 : index
    %c0_17 = arith.constant 0 : index
    %35 = vector.load %arg5[%c0_16, %c0_17] : memref<3x128xf32, #tpu.memory_space<vmem>>, vector<1x128xf32>
    %36 = vector.broadcast %35 : vector<1x128xf32> to vector<16x128xf32>
    %37 = arith.addf %34, %36 : vector<16x128xf32>
    %c1_18 = arith.constant 1 : index
    %c0_19 = arith.constant 0 : index
    %38 = vector.load %arg5[%c1_18, %c0_19] : memref<3x128xf32, #tpu.memory_space<vmem>>, vector<1x128xf32>
    %c2_20 = arith.constant 2 : index
    %c0_21 = arith.constant 0 : index
    %39 = vector.load %arg5[%c2_20, %c0_21] : memref<3x128xf32, #tpu.memory_space<vmem>>, vector<1x128xf32>
    %cst_22 = arith.constant dense<0.000000e+00> : vector<16xf32>
    %40 = vector.multi_reduction <add>, %37, %cst_22 [1] : vector<16x128xf32> to vector<16xf32>
    %41 = vector.shape_cast %40 : vector<16xf32> to vector<16x1xf32>
    %cst_23 = arith.constant 1.280000e+02 : f32
    %42 = vector.broadcast %cst_23 : f32 to vector<16x1xf32>
    %43 = arith.divf %41, %42 : vector<16x1xf32>
    %44 = arith.mulf %37, %37 : vector<16x128xf32>
    %cst_24 = arith.constant dense<0.000000e+00> : vector<16xf32>
    %45 = vector.multi_reduction <add>, %44, %cst_24 [1] : vector<16x128xf32> to vector<16xf32>
    %46 = vector.shape_cast %45 : vector<16xf32> to vector<16x1xf32>
    %cst_25 = arith.constant 1.280000e+02 : f32
    %47 = vector.broadcast %cst_25 : f32 to vector<16x1xf32>
    %48 = arith.divf %46, %47 : vector<16x1xf32>
    %49 = arith.mulf %43, %43 : vector<16x1xf32>
    %50 = arith.subf %48, %49 : vector<16x1xf32>
    %cst_26 = arith.constant 9.99999974E-6 : f32
    %51 = vector.broadcast %cst_26 : f32 to vector<16x1xf32>
    %52 = arith.addf %50, %51 : vector<16x1xf32>
    %53 = math.rsqrt %52 : vector<16x1xf32>
    %54 = vector.broadcast %43 : vector<16x1xf32> to vector<16x128xf32>
    %55 = arith.subf %37, %54 : vector<16x128xf32>
    %56 = vector.broadcast %53 : vector<16x1xf32> to vector<16x128xf32>
    %57 = arith.mulf %55, %56 : vector<16x128xf32>
    %58 = vector.broadcast %38 : vector<1x128xf32> to vector<16x128xf32>
    %59 = arith.mulf %57, %58 : vector<16x128xf32>
    %60 = vector.broadcast %39 : vector<1x128xf32> to vector<16x128xf32>
    %61 = arith.addf %59, %60 : vector<16x128xf32>
    %cst_27 = arith.constant 0.000000e+00 : f32
    %62 = vector.broadcast %cst_27 : f32 to vector<16x128xf32>
    %63 = arith.maximumf %61, %62 : vector<16x128xf32>
    %64 = arith.truncf %63 : vector<16x128xf32> to vector<16x128xbf16>
    %c0_28 = arith.constant 0 : index
    %c0_29 = arith.constant 0 : index
    %65 = vector.load %arg6[%c0_28, %c0_29] : memref<128x128xbf16, #tpu.memory_space<vmem>>, vector<128x128xbf16>
    %cst_30 = arith.constant dense<0.000000e+00> : vector<16x128xf32>
    %66 = tpu.matmul %64, %65, %cst_30 {dimension_numbers = #tpu.dot_dimension_numbers<[1], [0], [0], [1], [0, 0, 1, 1], [], []>} : vector<16x128xbf16>, vector<128x128xbf16>, vector<16x128xf32> -> vector<16x128xf32>
    %c0_31 = arith.constant 0 : index
    %c0_32 = arith.constant 0 : index
    %67 = vector.load %arg7[%c0_31, %c0_32] : memref<2x128xf32, #tpu.memory_space<vmem>>, vector<1x128xf32>
    %68 = vector.broadcast %67 : vector<1x128xf32> to vector<16x128xf32>
    %69 = arith.addf %66, %68 : vector<16x128xf32>
    %c1_33 = arith.constant 1 : index
    %c0_34 = arith.constant 0 : index
    %70 = vector.load %arg7[%c1_33, %c0_34] : memref<2x128xf32, #tpu.memory_space<vmem>>, vector<1x128xf32>
    %71 = math.tanh %69 : vector<16x128xf32>
    %72 = vector.broadcast %70 : vector<1x128xf32> to vector<16x128xf32>
    %73 = arith.mulf %72, %71 : vector<16x128xf32>
    %c0_35 = arith.constant 0 : index
    %c0_36 = arith.constant 0 : index
    %74 = vector.load %arg8[%c0_35, %c0_36] : memref<16x128xf32, #tpu.memory_space<vmem>>, vector<16x128xf32>
    tpu.vector_store %arg8[%c0_35, %c0_36], %73 {strides = array<i32>} : memref<16x128xf32, #tpu.memory_space<vmem>>, vector<16x128xf32>,
    return
  }
  func.func @transform_0(%arg0: i32) -> (i32, i32) {
    %c0_i32 = arith.constant 0 : i32
    %c0_i32_0 = arith.constant 0 : i32
    return %arg0, %c0_i32 : i32, i32
  }
  func.func @transform_1(%arg0: i32) -> (i32, i32) {
    %c0_i32 = arith.constant 0 : i32
    %c0_i32_0 = arith.constant 0 : i32
    %c0_i32_1 = arith.constant 0 : i32
    return %c0_i32, %c0_i32_0 : i32, i32
  }
  func.func @transform_2(%arg0: i32) -> (i32, i32) {
    %c0_i32 = arith.constant 0 : i32
    %c0_i32_0 = arith.constant 0 : i32
    %c0_i32_1 = arith.constant 0 : i32
    return %c0_i32, %c0_i32_0 : i32, i32
  }
  func.func @transform_3(%arg0: i32) -> (i32, i32) {
    %c0_i32 = arith.constant 0 : i32
    %c0_i32_0 = arith.constant 0 : i32
    %c0_i32_1 = arith.constant 0 : i32
    return %c0_i32, %c0_i32_0 : i32, i32
  }
  func.func @transform_4(%arg0: i32) -> (i32, i32) {
    %c0_i32 = arith.constant 0 : i32
    %c0_i32_0 = arith.constant 0 : i32
    %c0_i32_1 = arith.constant 0 : i32
    return %c0_i32, %c0_i32_0 : i32, i32
  }
  func.func @transform_5(%arg0: i32) -> (i32, i32) {
    %c0_i32 = arith.constant 0 : i32
    %c0_i32_0 = arith.constant 0 : i32
    %c0_i32_1 = arith.constant 0 : i32
    return %c0_i32, %c0_i32_0 : i32, i32
  }
  func.func @transform_6(%arg0: i32) -> (i32, i32) {
    %c0_i32 = arith.constant 0 : i32
    %c0_i32_0 = arith.constant 0 : i32
    %c0_i32_1 = arith.constant 0 : i32
    return %c0_i32, %c0_i32_0 : i32, i32
  }
  func.func @transform_7(%arg0: i32) -> (i32, i32) {
    %c0_i32 = arith.constant 0 : i32
    %c0_i32_0 = arith.constant 0 : i32
    return %arg0, %c0_i32 : i32, i32
  }
}

</mosaic_0001>

<bundles_post_ra>
// kernel: actor_forward.1
= control target key start
LH: loop header
LB: loop body
LE: loop exit
PB: predicated region body
PF: predicated region fallthrough
CT: control target
= control target key end

     0   :  { %s938_s24 = smov 0   ;;  %s1055_s0 = inlined_call_operand.vmem [shape: f32[32,8], index: 0, kind: input, shape index: {}]   ;;  %s1056_s1 = inlined_call_operand.vmem [shape: f32[8,128], index: 1, kind: input, shape index: {}]   ;;  %s1057_s2 = inlined_call_operand.vmem [shape: f32[3,128], index: 2, kind: input, shape index: {}]   ;;  %s1058_s3 = inlined_call_operand.vmem [shape: bf16[128,128], index: 3, kind: input, shape index: {}]   ;;  %s1059_s4 = inlined_call_operand.vmem [shape: f32[3,128], index: 4, kind: input, shape index: {}]   ;;  %s1060_s5 = inlined_call_operand.vmem [shape: bf16[128,128], index: 5, kind: input, shape index: {}]   ;;  %s1061_s6 = inlined_call_operand.vmem [shape: f32[2,128], index: 6, kind: input, shape index: {}]   ;;  %s1062_s7 = inlined_call_operand.vmem [shape: f32[32,128], index: 7, kind: output, shape index: {}]  }
   0x1 LB: > { %s747_s25 = sadd.s32 4294967295, %s894_s24   ;;  %p751_p0 = scmp.ge.s32.totalorder %s894_s24, 1  ;;  %s894_s24 = sphi %s938_s24, %s17_s24  }
   0x2   : > { %p238_p1 = scmp.lt.s32.totalorder %s894_s24, 3 }
   0x4   : > { %p239_p2 = pnand %p751_p0, %p238_p1 }
   0x5   : > { %v285_v0 = vld [vmem:[%s1056_s1] sm:$0xff] (!%p239_p2)  ;;  %s752_s28 = sshll.u32 (!%p239_p2), %s747_s25, 1  ;;  %vm291_vm0 = vcmask (!%p239_p2), 64512   ;;  %v896_v11 = vmov (!%p239_p2), 0.0   ;;  %v861_v12 = vld [vmem:[%s1058_s3 + $0x8] sm:$0xff] (!%p239_p2)   ;;  %v862_v13 = vld [vmem:[%s1058_s3 + $0x10] sm:$0xff] (!%p239_p2)  }
   0x6   : > { %242 = sbr.rel (%p239_p2) target bundleno = 1027 (0x403), region = 48  ;;  %805 = vmatprep.subr.mxu0 (!%p239_p2), %v285_v0  ;;  %p271_p3 = scmp.lt.s32.totalorder (!%p239_p2), %s752_s28, 3  ;;  %v756_v3 = vld [vmem:[%s1057_s2] ss:$0 sm:$0xff] (!%p239_p2)  ;;  %810 = vmatprep.subr.bf16.mxu1 (!%p239_p2), %v896_v11  ;;  %v863_v14 = vld [vmem:[%s1058_s3 + $0x18] sm:$0xff] (!%p239_p2)   ;;  %vm897_vm1 = vmmov (!%p239_p2), 0  }
   0x7   : > { %806 = vmatpush3.msra.mxu0 (!%p239_p2), %v285_v0  ;;  %v860_v10 = vld [vmem:[%s1058_s3] sm:$0xff] (!%p239_p2)   ;;  %826 = vmatprep.mubr.msk.bf16.mxu1 (!%p239_p2), %vm897_vm1, %v896_v11  ;;  %v865_v16 = vld [vmem:[%s1058_s3 + $0x28] sm:$0xff] (!%p239_p2)   ;;  %v866_v17 = vld [vmem:[%s1058_s3 + $0x30] sm:$0xff] (!%p239_p2)  }
   0x8   : > { %830 = vmatprep.subr.bf16.mxu0 (!%p239_p2), %v896_v11  ;;  %811 = vmatpush3.bf16.msra.mxu1 (!%p239_p2), %v860_v10  ;;  %v864_v15 = vld [vmem:[%s1058_s3 + $0x20] sm:$0xff] (!%p239_p2)   ;;  %v867_v18 = vld [vmem:[%s1058_s3 + $0x38] sm:$0xff] (!%p239_p2)   ;;  %v869_v58 = vld [vmem:[%s1060_s5 + $0x8] sm:$0xff] (!%p239_p2)  }
   0x9   : > { %812 = vmatprep.subr.bf16.mxu1 (!%p239_p2), %v896_v11  ;;  %v759_v35 = vld [vmem:[%s1057_s2 + $0x1] ss:$0 sm:$0xff] (!%p239_p2)  ;;  %v760_v40 = vld [vmem:[%s1057_s2 + $0x2] ss:$0 sm:$0xff] (!%p239_p2)  ;;  %v761_v48 = vld [vmem:[%s1059_s4] ss:$0 sm:$0xff] (!%p239_p2) }
   0xa   : > { %v868_v57 = vld [vmem:[%s1060_s5] sm:$0xff] (!%p239_p2)   ;;  %v870_v59 = vld [vmem:[%s1060_s5 + $0x10] sm:$0xff] (!%p239_p2)   ;;  %v871_v60 = vld [vmem:[%s1060_s5 + $0x18] sm:$0xff] (!%p239_p2)  }
   0xb   : > { %v872_v61 = vld [vmem:[%s1060_s5 + $0x20] sm:$0xff] (!%p239_p2)   ;;  %v873_v62 = vld [vmem:[%s1060_s5 + $0x28] sm:$0xff] (!%p239_p2)   ;;  %v874_v63 = vld [vmem:[%s1060_s5 + $0x30] sm:$0xff] (!%p239_p2)  }
   0xc   : > { %813 = vmatpush3.bf16.msra.mxu1 (!%p239_p2), %v861_v12  ;;  %v875_v0 = vld [vmem:[%s1060_s5 + $0x38] sm:$0xff] (!%p239_p2)  }
   0xd   : > { %s1064_s28 = smov (!%p271_p3, %s752_s28), 3  ;;  %814 = vmatprep.subr.bf16.mxu1 %v896_v11 }
   0xe   : > { %s753_s29 = sshll.u32 %s1064_s28, 3 }
   0xf   : > { %s274_s9 = scalar_lea.vmem %s1055_s0, %s753_s29  ;;  %s280_s20 = scalar_lea.vmem %s1062_s7, %s753_s29 }
  0x10   : > { %v283_v1 = vld [vmem:[%s274_s9] sm:$0xff]  ;;  %v284_v2 = vld [vmem:[%s274_s9 + $0x8] sm:$0xff]  ;;  %815 = vmatpush3.bf16.msra.mxu1 %v862_v13 }
  0x11   : > { %807 = vmatprep.mubr.msk.f32.mxu0 %vm291_vm0, %v283_v1  ;;  %816 = vmatprep.subr.bf16.mxu1 %v896_v11 }
  0x12   : > { %808 = vmatmul.mubr.msk.f32.vlgmr.msra.gmra.mrb[0].mxu0 %vm291_vm0, %v284_v2 }
  0x13   : > { %846 = vmatprep.mubr.msk.bf16.mxu0 %vm897_vm1, %v896_v11  ;;  %831 = vmatpush3.bf16.msra.mxu0 %v868_v57 }
  0x14   : > { %817 = vmatpush3.bf16.msra.mxu1 %v863_v14  ;;  %832 = vmatprep.subr.bf16.mxu0 %v896_v11 }
  0x15   : > { %818 = vmatprep.subr.bf16.mxu1 %v896_v11 }
  0x17   : > { %833 = vmatpush3.bf16.msra.mxu0 %v869_v58 }
  0x18   : > { %819 = vmatpush3.bf16.msra.mxu1 %v864_v15  ;;  %834 = vmatprep.subr.bf16.mxu0 %v896_v11 }
  0x19   : > { %820 = vmatprep.subr.bf16.mxu1 %v896_v11 }
  0x1b   : > { %835 = vmatpush3.bf16.msra.mxu0 %v870_v59 }
  0x1c   : > { %821 = vmatpush3.bf16.msra.mxu1 %v865_v16  ;;  %836 = vmatprep.subr.bf16.mxu0 %v896_v11 }
  0x1d   : > { %822 = vmatprep.subr.bf16.mxu1 %v896_v11 }
  0x1f   : > { %837 = vmatpush3.bf16.msra.mxu0 %v871_v60 }
  0x20   : > { %823 = vmatpush3.bf16.msra.mxu1 %v866_v17  ;;  %838 = vmatprep.subr.bf16.mxu0 %v896_v11 }
  0x21   : > { %824 = vmatprep.subr.bf16.mxu1 %v896_v11 }
  0x23   : > { %839 = vmatpush3.bf16.msra.mxu0 %v872_v61 }
  0x24   : > { %825 = vmatpush3.bf16.msra.mxu1 %v867_v18  ;;  %840 = vmatprep.subr.bf16.mxu0 %v896_v11 }
  0x27   : > { %841 = vmatpush3.bf16.msra.mxu0 %v873_v62 }
  0x28   : > { %842 = vmatprep.subr.bf16.mxu0 %v896_v11 }
  0x2b   : > { %843 = vmatpush3.bf16.msra.mxu0 %v874_v63 }
  0x2c   : > { %844 = vmatprep.subr.bf16.mxu0 %v896_v11  ;;  %v770_v11 = vld [vmem:[%s1059_s4 + $0x1] ss:$0 sm:$0xff] }
  0x2f   : > { %845 = vmatpush3.bf16.msra.mxu0 %v875_v0 }
  0xe5   : > { %v809_v4 = vpop.f32.mrb[0].mxu0 }
  0xe6   : > { %v364_v5 = vpop.f32.mrb[1].mxu0  ;;  %v370_v7 = vadd.f32 %v809_v4, %v756_v3 }
  0xe7   : > { %v365_v6 = vadd.f32 %v756_v3, %v364_v5 }
  0xe8   : > { %v383_v9 = vmul.f32 %v370_v7, %v370_v7 }
  0xe9   : > { %375 = vadd.xlane.f32.xlu0 %v365_v6  ;;  %v382_v8 = vmul.f32 %v365_v6, %v365_v6 }
  0xeb   : > { %384 = vadd.xlane.f32.xlu1 %v382_v8 }
  0xed   : > { %377 = vadd.xlane.f32.xlu0 %v370_v7 }
  0xef   : > { %386 = vadd.xlane.f32.xlu1 %v383_v9 }
 0x176   : > { %v376_v19 = vpop.xlane.xlu0 %375 }
 0x177   : > { %v380_v20 = vmul.f32 0.0078125, %v376_v19 }
 0x178   : > { %v385_v21 = vpop.xlane.xlu1 %384 }
 0x179   : > { %v390_v22 = vmul.f32 %v380_v20, %v380_v20  ;;  %v388_v23 = vmul.f32 0.0078125, %v385_v21  ;;  %v398_v33 = vsub.f32 %v365_v6, %v380_v20  ;;  %v771_v21 = vld [vmem:[%s1059_s4 + $0x2] ss:$0 sm:$0xff] }
 0x17a   : > { %v378_v24 = vpop.xlane.xlu0 %377 }
 0x17b   : > { %v392_v25 = vsub.f32 %v388_v23, %v390_v22  ;;  %v381_v26 = vmul.f32 0.0078125, %v378_v24 }
 0x17c   : > { %v387_v27 = vpop.xlane.xlu1 %386 }
 0x17d   : > { %v394_v28 = vadd.f32 1e-05, %v392_v25  ;;  %v391_v29 = vmul.f32 %v381_v26, %v381_v26  ;;  %v389_v30 = vmul.f32 0.0078125, %v387_v27  ;;  %v399_v37 = vsub.f32 %v370_v7, %v381_v26 }
 0x17f   : > { %876 = vrsqrt.f32 %v394_v28  ;;  %v393_v31 = vsub.f32 %v389_v30, %v391_v29  ;;  %v772_v30 = vld [vmem:[%s1061_s6] ss:$0 sm:$0xff] }
 0x181   : > { %v395_v32 = vadd.f32 1e-05, %v393_v31 }
 0x183   : > { %878 = vrsqrt.f32 %v395_v32 }
 0x189   : > { %v877_v34 = vpop.eup %876 }
 0x18a   : > { %v400_v36 = vmul.f32 %v877_v34, %v398_v33 }
 0x18c   : > { %v406_v38 = vmul.f32 %v759_v35, %v400_v36 }
 0x18d   : > { %v879_v39 = vpop.eup %878 }
 0x18e   : > { %v401_v41 = vmul.f32 %v879_v39, %v399_v37  ;;  %v412_v43 = vadd.f32 %v760_v40, %v406_v38  ;;  %v781_v37 = vld [vmem:[%s1061_s6 + $0x1] ss:$0 sm:$0xff] }
 0x190   : > { %v407_v42 = vmul.f32 %v759_v35, %v401_v41  ;;  %v414_v45 = vmax.f32 %v412_v43, 0.0 }
 0x192   : > { %v413_v44 = vadd.f32 %v760_v40, %v407_v42 }
 0x194   : > { %v415_v46 = vmax.f32 %v413_v44, 0.0 }
 0x196   : > { %v416_v47 = vpack.c.bf16 %v415_v46, %v414_v45 }
 0x198   : > { %827 = vmatmul.mubr.bf16.vlgmr.msra.gmra.mrb[0].mxu1 %v416_v47 }
 0x26b   : > { %v520_v49 = vpop.f32.mrb[0].mxu1 }
 0x26c   : > { %v521_v50 = vadd.f32 %v761_v48, %v520_v49  ;;  %v828_v51 = vpop.f32.mrb[1].mxu1 }
 0x26d   : > { %v523_v52 = vpop.f32.mrb[2].mxu1 }
 0x26e   : > { %v524_v53 = vadd.f32 %v761_v48, %v523_v52  ;;  %529 = vadd.xlane.f32.xlu0 %v521_v50  ;;  %v829_v54 = vpop.f32.mrb[3].mxu1  ;;  %v535_v55 = vmul.f32 %v521_v50, %v521_v50 }
 0x270   : > { %531 = vadd.xlane.f32.xlu1 %v524_v53  ;;  %v536_v56 = vmul.f32 %v524_v53, %v524_v53 }
 0x272   : > { %537 = vadd.xlane.f32.xlu0 %v535_v55 }
 0x274   : > { %539 = vadd.xlane.f32.xlu1 %v536_v56 }
 0x2fb   : > { %v530_v1 = vpop.xlane.xlu0 %529 }
 0x2fc   : > { %v533_v2 = vmul.f32 0.0078125, %v530_v1 }
 0x2fd   : > { %v532_v3 = vpop.xlane.xlu1 %531 }
 0x2fe   : > { %v534_v4 = vmul.f32 0.0078125, %v532_v3  ;;  %v543_v6 = vmul.f32 %v533_v2, %v533_v2  ;;  %v551_v16 = vsub.f32 %v521_v50, %v533_v2 }
 0x2ff   : > { %v538_v5 = vpop.xlane.xlu0 %537 }
 0x300   : > { %v541_v7 = vmul.f32 0.0078125, %v538_v5  ;;  %v544_v9 = vmul.f32 %v534_v4, %v534_v4  ;;  %v552_v18 = vsub.f32 %v524_v53, %v534_v4 }
 0x301   : > { %v540_v8 = vpop.xlane.xlu1 %539 }
 0x302   : > { %v545_v10 = vsub.f32 %v541_v7, %v543_v6  ;;  %v542_v12 = vmul.f32 0.0078125, %v540_v8 }
 0x304   : > { %v547_v13 = vadd.f32 1e-05, %v545_v10  ;;  %v546_v14 = vsub.f32 %v542_v12, %v544_v9 }
 0x306   : > { %880 = vrsqrt.f32 %v547_v13  ;;  %v548_v15 = vadd.f32 1e-05, %v546_v14 }
 0x308   : > { %882 = vrsqrt.f32 %v548_v15 }
 0x310   : > { %v881_v17 = vpop.eup %880 }
 0x311   : > { %v553_v19 = vmul.f32 %v881_v17, %v551_v16 }
 0x312   : > { %v883_v20 = vpop.eup %882 }
 0x313   : > { %v554_v22 = vmul.f32 %v883_v20, %v552_v18  ;;  %v559_v23 = vmul.f32 %v770_v11, %v553_v19 }
 0x315   : > { %v560_v24 = vmul.f32 %v770_v11, %v554_v22  ;;  %v565_v25 = vadd.f32 %v771_v21, %v559_v23 }
 0x317   : > { %v566_v26 = vadd.f32 %v771_v21, %v560_v24  ;;  %v567_v27 = vmax.f32 %v565_v25, 0.0 }
 0x319   : > { %v568_v28 = vmax.f32 %v566_v26, 0.0 }
 0x31b   : > { %v569_v29 = vpack.c.bf16 %v568_v28, %v567_v27 }
 0x31d   : > { %847 = vmatmul.mubr.bf16.vlgmr.msra.gmra.mrb[4].mxu0 %v569_v29 }
 0x3f0   : > { %v673_v31 = vpop.f32.mrb[4].mxu0 }
 0x3f1   : > { %v674_v32 = vadd.f32 %v772_v30, %v673_v31  ;;  %v848_v33 = vpop.f32.mrb[5].mxu0 }
 0x3f2   : > { %v676_v34 = vpop.f32.mrb[6].mxu0 }
 0x3f3   : > { %884 = vtanh.f32 %v674_v32  ;;  %v677_v35 = vadd.f32 %v772_v30, %v676_v34  ;;  %v849_v36 = vpop.f32.mrb[7].mxu0 }
 0x3f5   : > { %886 = vtanh.f32 %v677_v35 }
 0x3fd   : > { %v885_v38 = vpop.eup %884 }
 0x3fe   : > { %v687_v39 = vmul.f32 %v885_v38, %v781_v37 }
 0x3ff   : > { %v887_v40 = vpop.eup %886 }
 0x400   : > { %689 = vst [vmem:[%s280_s20] sm:$0xff] %v687_v39  ;;  %v688_v41 = vmul.f32 %v887_v40, %v781_v37 }
 0x402   : > { %690 = vst [vmem:[%s280_s20 + $0x8] sm:$0xff] %v688_v41 }
 0x403 PF: > { %s17_s24 = sadd.s32 1, %s894_s24  }
 0x404   : > { %p14_p4 = scmp.ge.s32.totalorder %s17_s24, 4  }
 0x406   :  { %16 = sbr.rel (!%p14_p4) target bundleno = 1 (0x1), region = 78 }

</bundles_post_ra>
